<compile_context>
chip_gen: v5e
topology: v5e:2x2
jax: 0.10.0
libtpu: 0.0.40
codegen_flags: <defaults>
</compile_context>

<pallas_src>
import functools

import jax
import jax.numpy as jnp
import numpy as np
from jax.experimental import pallas as pl
from jax.experimental.pallas import tpu as pltpu


def _round_up(x, m):
    return ((x + m - 1) // m) * m


def _block_diag(w):
    """(nb, r, c) per-block weights -> dense (nb*r, nb*c) block-diagonal."""
    nb, r, c = w.shape
    eye = jnp.eye(nb, dtype=w.dtype)
    d = jnp.einsum("brc,bk->brkc", w, eye)   # d[b, :, b, :] = w[b]
    return d.reshape(nb * r, nb * c)


def _vmem_capacity_bytes():
    """Generation-aware VMEM capacity (conservative 64 MiB fallback = v7x)."""
    try:
        cap = getattr(pltpu.get_tpu_info(), "vmem_capacity_bytes", None)
        if cap:
            return int(cap)
    except Exception:
        pass
    return 64 * (1 << 20)


def _fold_factor(c2):
    """Smallest row-fold k giving a lane width >= 128 (prefer exact x128)."""
    if c2 >= 128:
        return 1
    for k in range(1, 9):
        if (k * c2) % 128 == 0:
            return k
    return -(-128 // c2)


def _choose_tile_m(mk, lane_w, elem_bytes, vmem_cap):
    # 128 MiB parts (v5e/v6e): bigger tiles amortize the per-step overhead;
    # 64 MiB (v7x): keep the double-buffered activation blocks ~12 MiB.
    if vmem_cap >= 96 * (1 << 20):
        act_budget, row_cap = 24 * (1 << 20), 4096
    else:
        act_budget, row_cap = 12 * (1 << 20), 1024
    per_row = 2 * 2 * lane_w * elem_bytes      # in + out, double-buffered
    t = max(16, min(row_cap, act_budget // per_row))
    if mk > 16:                                 # >=2 grid steps -> v7x megacore
        t = min(t, _round_up(pl.cdiv(mk, 2), 16))
    t = max(16, (int(t) // 16) * 16)
    return min(t, _round_up(mk, 16))


# ----------------------------------------------------------------------------
# Pallas kernel: packed real/imag 2-layer spectral MLP + softshrink
# ----------------------------------------------------------------------------
def _afno_mlp_kernel(x_ref, w1_ref, b1_ref, w2_ref, b2_ref, o_ref, *, lam):
    f32 = jnp.float32
    # Layer 1: bf16 x bf16 MXU matmul with f32 accumulation (the 2x2 real
    # packing of the complex product), then f32 bias + ReLU on the VPU.
    h = jnp.dot(x_ref[...], w1_ref[...], preferred_element_type=f32)
    h = jnp.maximum(h + b1_ref[...], 0.0)
    # Layer 2: packed complex matmul + bias (f32 accumulate).
    o = jnp.dot(h.astype(jnp.bfloat16), w2_ref[...], preferred_element_type=f32)
    o = o + b2_ref[...]
    # Softshrink (lambda = sparsity_threshold), in f32, matching F.softshrink.
    o = jnp.where(o > lam, o - lam, jnp.where(o < -lam, o + lam, 0.0))
    o_ref[...] = o.astype(o_ref.dtype)


def _run_spectral_mlp(xp, w1, b1, w2, b2, *, lam, tile_m, vmem_cap):
    """xp: (Mp, L) bf16 lane-folded packed [real|imag]; returns (Mp, L) bf16."""
    Mp, Lin = xp.shape
    Lhid = w1.shape[1]
    grid = (Mp // tile_m,)

    # TODO(synk): at production widths consider pipeline_mode=pl.Buffered(1)
    # for the constant weight operands; bf16 weights already halve that VMEM.
    in_specs = [
        pl.BlockSpec((tile_m, Lin), lambda m: (m, 0)),   # activations (M-tiled)
        pl.BlockSpec((Lin, Lhid), lambda m: (0, 0)),     # W1 (VMEM-resident)
        pl.BlockSpec((1, Lhid), lambda m: (0, 0)),       # b1 (f32)
        pl.BlockSpec((Lhid, Lin), lambda m: (0, 0)),     # W2
        pl.BlockSpec((1, Lin), lambda m: (0, 0)),        # b2 (f32)
    ]

    act_bytes = xp.dtype.itemsize
    w_bytes = w1.dtype.itemsize
    need = 2 * (2 * 2 * tile_m * Lin * act_bytes          # in+out, dbl-buffered
                + (Lin * Lhid + Lhid * Lin) * w_bytes     # weights (dbl reserve)
                + (Lhid + Lin) * 4)                       # biases
    vmem_limit = None
    if need > 24 * (1 << 20):
        vmem_limit = int(min(need * 3 // 2, vmem_cap * 3 // 4))

    cost = pl.CostEstimate(
        flops=int(4 * Mp * Lin * Lhid),
        transcendentals=0,
        bytes_accessed=int(2 * Mp * Lin * act_bytes
                           + 2 * Lin * Lhid * w_bytes + (Lhid + Lin) * 4),
    )

    kernel = functools.partial(_afno_mlp_kernel, lam=lam)
    return pl.pallas_call(
        kernel,
        out_shape=jax.ShapeDtypeStruct((Mp, Lin), xp.dtype),
        grid_spec=pltpu.PrefetchScalarGridSpec(
            num_scalar_prefetch=0,
            grid=grid,
            in_specs=in_specs,
            out_specs=pl.BlockSpec((tile_m, Lin), lambda m: (m, 0)),
        ),
        compiler_params=pltpu.CompilerParams(
            dimension_semantics=("parallel",),
            vmem_limit_bytes=vmem_limit,
        ),
        cost_estimate=cost,
    )(xp, w1, b1, w2, b2)


# ----------------------------------------------------------------------------
# Full AFNO2DLayer forward (FFT glue in plain JAX, spectral MLP in Pallas)
# ----------------------------------------------------------------------------
def afno2d_forward(x, params, *, num_blocks, sparsity_threshold=0.01,
                   hard_thresholding_fraction=1.0, hidden_size_factor=1,
                   tile_m=None):
    del num_blocks  # block structure is implicit in the parameter shapes
    bias = x
    dtype = x.dtype
    B, H, W, C = x.shape
    Wf = W // 2 + 1

    # TODO(synk): rfft2/irfft2 have no Pallas TPU equivalent; they stay in XLA.
    xf = jnp.fft.rfft2(x.astype(jnp.float32), axes=(1, 2), norm="ortho")

    # Hard-thresholding: static slice of the contiguous kept-mode window
    # (instead of a full-M mask) -- mirrors the PyTorch implementation.
    total_modes = H // 2 + 1
    kept_modes = int(total_modes * hard_thresholding_fraction)
    h_lo = max(0, total_modes - kept_modes)
    h_hi = min(H, total_modes + kept_modes)
    w_hi = min(Wf, kept_modes)
    Hk, Wk = h_hi - h_lo, w_hi
    if Hk <= 0 or Wk <= 0:        # every mode dropped -> spectral output is 0
        return bias
    xk = xf[:, h_lo:h_hi, :w_hi, :]                      # (B, Hk, Wk, C)

    # Lane-dense packed activations [real | imag], bf16 HBM I/O.
    M = B * Hk * Wk
    C2 = 2 * C
    xp = jnp.concatenate(
        [jnp.real(xk).reshape(M, C), jnp.imag(xk).reshape(M, C)], axis=-1)

    # Lane folding: put k consecutive spectral rows on the lane axis so the
    # kernel last dim is >= 128 (unmasked stores, full MXU K/N) when 2C < 128.
    k_fold = _fold_factor(C2)
    Mk = -(-M // k_fold)
    if Mk * k_fold != M:
        xp = jnp.pad(xp, ((0, Mk * k_fold - M), (0, 0)))
    xp = xp.reshape(Mk, k_fold * C2).astype(jnp.bfloat16)

    # Dense block-diagonal weights, 2x2 real packing of the complex matmul,
    # then kron(I_k, .) for the lane folding.  bf16 weights, f32 biases.
    # TODO(synk): at production widths (C >= 512, nb >= 8) add a block axis to
    # the grid instead of the dense (2C, 2Cf) expansion (nb-fold MXU/VMEM tax).
    w1, b1, w2, b2 = params["w1"], params["b1"], params["w2"], params["b2"]
    w1r, w1i = _block_diag(w1[0]), _block_diag(w1[1])     # (C, Cf)
    w2r, w2i = _block_diag(w2[0]), _block_diag(w2[1])     # (Cf, C)
    W1 = jnp.block([[w1r, w1i], [-w1i, w1r]])             # (2C, 2Cf)
    W2 = jnp.block([[w2r, w2i], [-w2i, w2r]])             # (2Cf, 2C)
    B1 = jnp.concatenate([b1[0].reshape(-1), b1[1].reshape(-1)])
    B2 = jnp.concatenate([b2[0].reshape(-1), b2[1].reshape(-1)])
    if k_fold > 1:
        eye = jnp.eye(k_fold, dtype=W1.dtype)
        W1, W2 = jnp.kron(eye, W1), jnp.kron(eye, W2)
        B1, B2 = jnp.tile(B1, k_fold), jnp.tile(B2, k_fold)
    W1 = W1.astype(jnp.bfloat16)
    W2 = W2.astype(jnp.bfloat16)
    B1 = B1.reshape(1, -1).astype(jnp.float32)
    B2 = B2.reshape(1, -1).astype(jnp.float32)

    # Row tiling (generation-aware budgets, >=2 grid steps for v7x megacore).
    vmem_cap = _vmem_capacity_bytes()
    if tile_m is None:
        tile_m = _choose_tile_m(Mk, k_fold * C2, xp.dtype.itemsize, vmem_cap)
    tile_m = max(16, (int(tile_m) // 16) * 16)
    Mp = _round_up(Mk, tile_m)
    if Mp != Mk:
        xp = jnp.pad(xp, ((0, Mp - Mk), (0, 0)))

    out_p = _run_spectral_mlp(xp, W1, B1, W2, B2,
                              lam=float(sparsity_threshold), tile_m=tile_m,
                              vmem_cap=vmem_cap)

    # Unfold, unpack, zero-pad the dropped modes back, inverse FFT.
    out_p = out_p[:Mk].astype(jnp.float32).reshape(Mk * k_fold, C2)[:M]
    okr = out_p[:, :C].reshape(B, Hk, Wk, C)
    oki = out_p[:, C:].reshape(B, Hk, Wk, C)
    oc = okr + 1j * oki
    if (h_lo, h_hi, w_hi) != (0, H, Wf):
        oc = jnp.pad(oc, ((0, 0), (h_lo, H - h_hi), (0, Wf - w_hi), (0, 0)))

    out = jnp.fft.irfft2(oc, s=(H, W), axes=(1, 2), norm="ortho")
    return out.astype(dtype) + bias


# ----------------------------------------------------------------------------
# Pure-JAX reference (mirrors the PyTorch forward) for a correctness check
# ----------------------------------------------------------------------------
def afno2d_reference(x, params, *, num_blocks, sparsity_threshold=0.01,
                     hard_thresholding_fraction=1.0, hidden_size_factor=1):
    bias = x
    dtype = x.dtype
    B, H, W, C = x.shape
    nb = num_blocks
    bs = C // nb
    Wf = W // 2 + 1
    xf = jnp.fft.rfft2(x.astype(jnp.float32), axes=(1, 2), norm="ortho")
    xr = jnp.real(xf).reshape(B, H, Wf, nb, bs)
    xi = jnp.imag(xf).reshape(B, H, Wf, nb, bs)
    w1, b1, w2, b2 = params["w1"], params["b1"], params["w2"], params["b2"]
    ein = functools.partial(jnp.einsum, "nyxbi,bio->nyxbo")
    o1r = jax.nn.relu(ein(xr, w1[0]) - ein(xi, w1[1]) + b1[0])
    o1i = jax.nn.relu(ein(xi, w1[0]) + ein(xr, w1[1]) + b1[1])
    o2r = ein(o1r, w2[0]) - ein(o1i, w2[1]) + b2[0]
    o2i = ein(o1i, w2[0]) + ein(o1r, w2[1]) + b2[1]
    lam = sparsity_threshold
    ss = lambda v: jnp.where(v > lam, v - lam, jnp.where(v < -lam, v + lam, 0.0))
    o2r, o2i = ss(o2r), ss(o2i)
    total_modes = H // 2 + 1
    kept_modes = int(total_modes * hard_thresholding_fraction)
    h_idx = jnp.arange(H)
    w_idx = jnp.arange(Wf)
    h_mask = (h_idx >= total_modes - kept_modes) & (h_idx < total_modes + kept_modes)
    w_mask = w_idx < kept_modes
    msk = (h_mask[:, None] & w_mask[None, :])[None, :, :, None, None]
    o2r = jnp.where(msk, o2r, 0.0)
    o2i = jnp.where(msk, o2i, 0.0)
    xc = (o2r + 1j * o2i).reshape(B, H, Wf, C)
    out = jnp.fft.irfft2(xc, s=(H, W), axes=(1, 2), norm="ortho")
    return out.astype(dtype) + bias


if __name__ == "__main__":
    # Config: hidden_size=32, num_blocks=8 -> block_size=4, factor=1.
    B, H, W = 2, 16, 16
    hidden_size = 32
    num_blocks = 8
    block_size = hidden_size // num_blocks
    hidden_size_factor = 1
    scale = 0.02

    key = jax.random.PRNGKey(0)
    kx, kw1, kb1, kw2, kb2 = jax.random.split(key, 5)

    x = jax.random.normal(kx, (B, H, W, hidden_size), dtype=jnp.float32)
    params = {
        "w1": scale * jax.random.normal(
            kw1, (2, num_blocks, block_size, block_size * hidden_size_factor),
            dtype=jnp.float32),
        "b1": scale * jax.random.normal(
            kb1, (2, num_blocks, block_size * hidden_size_factor),
            dtype=jnp.float32),
        "w2": scale * jax.random.normal(
            kw2, (2, num_blocks, block_size * hidden_size_factor, block_size),
            dtype=jnp.float32),
        "b2": scale * jax.random.normal(
            kb2, (2, num_blocks, block_size), dtype=jnp.float32),
    }

    # (a) all modes kept, auto tile (>=2 grid steps); (b) hard thresholding
    # -> sliced kept-mode window, auto tile; (c) all modes, explicit tile that
    # divides the folded row count exactly (grid=3, no row padding).
    configs = [
        dict(hard_thresholding_fraction=1.0, tile_m=None),
        dict(hard_thresholding_fraction=0.5, tile_m=None),
        dict(hard_thresholding_fraction=1.0, tile_m=48),
    ]
    for cfg in configs:
        fwd = jax.jit(functools.partial(
            afno2d_forward, num_blocks=num_blocks, sparsity_threshold=0.01,
            hidden_size_factor=hidden_size_factor, **cfg))
        out = jax.block_until_ready(fwd(x, params))
        ref = jax.block_until_ready(afno2d_reference(
            x, params, num_blocks=num_blocks, sparsity_threshold=0.01,
            hard_thresholding_fraction=cfg["hard_thresholding_fraction"],
            hidden_size_factor=hidden_size_factor))
        # bf16 activation/weight I/O in the kernel -> slightly relaxed tolerance.
        np.testing.assert_allclose(np.asarray(out), np.asarray(ref),
                                   rtol=1e-2, atol=2e-3)

    print("KERNEL_OK")
</pallas_src>

<mosaic_0001>
module attributes {stable_mosaic.version = 11 : i64} {
  func.func @_afno_mlp_kernel(%arg0: i32, %arg1: memref<80x128xbf16, #tpu.memory_space<vmem>>, %arg2: memref<128x128xbf16, #tpu.memory_space<vmem>>, %arg3: memref<1x128xf32, #tpu.memory_space<vmem>>, %arg4: memref<128x128xbf16, #tpu.memory_space<vmem>>, %arg5: memref<1x128xf32, #tpu.memory_space<vmem>>, %arg6: memref<80x128xbf16, #tpu.memory_space<vmem>>) attributes {dimension_semantics = [#tpu.dimension_semantics<parallel>], iteration_bounds = array<i64: 2>, scalar_prefetch = 0 : i64, scratch_operands = 0 : i64, tpu.core_type = #tpu.core_type<tc>, window_params = [{transform_indices = @transform_0, window_bounds = array<i64: 80, 128>}, {pipeline_mode = #tpu.pipeline_mode<synchronous>, transform_indices = @transform_1, window_bounds = array<i64: 128, 128>}, {pipeline_mode = #tpu.pipeline_mode<synchronous>, transform_indices = @transform_2, window_bounds = array<i64: 1, 128>}, {pipeline_mode = #tpu.pipeline_mode<synchronous>, transform_indices = @transform_3, window_bounds = array<i64: 128, 128>}, {pipeline_mode = #tpu.pipeline_mode<synchronous>, transform_indices = @transform_4, window_bounds = array<i64: 1, 128>}, {transform_indices = @transform_5, window_bounds = array<i64: 80, 128>}]} {
    %c0 = arith.constant 0 : index
    %c0_0 = arith.constant 0 : index
    %0 = vector.load %arg1[%c0, %c0_0] : memref<80x128xbf16, #tpu.memory_space<vmem>>, vector<80x128xbf16>
    %c0_1 = arith.constant 0 : index
    %c0_2 = arith.constant 0 : index
    %1 = vector.load %arg2[%c0_1, %c0_2] : memref<128x128xbf16, #tpu.memory_space<vmem>>, vector<128x128xbf16>
    %cst = arith.constant dense<0.000000e+00> : vector<80x128xf32>
    %2 = tpu.matmul %0, %1, %cst {dimension_numbers = #tpu.dot_dimension_numbers<[1], [0], [0], [1], [0, 0, 1, 1], [], []>} : vector<80x128xbf16>, vector<128x128xbf16>, vector<80x128xf32> -> vector<80x128xf32>
    %c0_3 = arith.constant 0 : index
    %c0_4 = arith.constant 0 : index
    %3 = vector.load %arg3[%c0_3, %c0_4] : memref<1x128xf32, #tpu.memory_space<vmem>>, vector<1x128xf32>
    %4 = vector.broadcast %3 : vector<1x128xf32> to vector<80x128xf32>
    %5 = arith.addf %2, %4 : vector<80x128xf32>
    %cst_5 = arith.constant 0.000000e+00 : f32
    %6 = vector.broadcast %cst_5 : f32 to vector<80x128xf32>
    %7 = arith.maximumf %5, %6 : vector<80x128xf32>
    %8 = arith.truncf %7 : vector<80x128xf32> to vector<80x128xbf16>
    %c0_6 = arith.constant 0 : index
    %c0_7 = arith.constant 0 : index
    %9 = vector.load %arg4[%c0_6, %c0_7] : memref<128x128xbf16, #tpu.memory_space<vmem>>, vector<128x128xbf16>
    %cst_8 = arith.constant dense<0.000000e+00> : vector<80x128xf32>
    %10 = tpu.matmul %8, %9, %cst_8 {dimension_numbers = #tpu.dot_dimension_numbers<[1], [0], [0], [1], [0, 0, 1, 1], [], []>} : vector<80x128xbf16>, vector<128x128xbf16>, vector<80x128xf32> -> vector<80x128xf32>
    %c0_9 = arith.constant 0 : index
    %c0_10 = arith.constant 0 : index
    %11 = vector.load %arg5[%c0_9, %c0_10] : memref<1x128xf32, #tpu.memory_space<vmem>>, vector<1x128xf32>
    %12 = vector.broadcast %11 : vector<1x128xf32> to vector<80x128xf32>
    %13 = arith.addf %10, %12 : vector<80x128xf32>
    %cst_11 = arith.constant 0.00999999977 : f32
    %14 = vector.broadcast %cst_11 : f32 to vector<80x128xf32>
    %15 = arith.cmpf ogt, %13, %14 : vector<80x128xf32>
    %cst_12 = arith.constant 0.00999999977 : f32
    %16 = vector.broadcast %cst_12 : f32 to vector<80x128xf32>
    %17 = arith.subf %13, %16 : vector<80x128xf32>
    %cst_13 = arith.constant -0.00999999977 : f32
    %18 = vector.broadcast %cst_13 : f32 to vector<80x128xf32>
    %19 = arith.cmpf olt, %13, %18 : vector<80x128xf32>
    %cst_14 = arith.constant 0.00999999977 : f32
    %20 = vector.broadcast %cst_14 : f32 to vector<80x128xf32>
    %21 = arith.addf %13, %20 : vector<80x128xf32>
    %cst_15 = arith.constant 0.000000e+00 : f32
    %22 = vector.broadcast %cst_15 : f32 to vector<80x128xf32>
    %23 = arith.select %19, %21, %22 : vector<80x128xi1>, vector<80x128xf32>
    %24 = arith.select %15, %17, %23 : vector<80x128xi1>, vector<80x128xf32>
    %25 = arith.truncf %24 : vector<80x128xf32> to vector<80x128xbf16>
    %c0_16 = arith.constant 0 : index
    %c0_17 = arith.constant 0 : index
    %26 = vector.load %arg6[%c0_16, %c0_17] : memref<80x128xbf16, #tpu.memory_space<vmem>>, vector<80x128xbf16>
    tpu.vector_store %arg6[%c0_16, %c0_17], %25 {strides = array<i32>} : memref<80x128xbf16, #tpu.memory_space<vmem>>, vector<80x128xbf16>,
    return
  }
  func.func @transform_0(%arg0: i32) -> (i32, i32) {
    %c0_i32 = arith.constant 0 : i32
    %c0_i32_0 = arith.constant 0 : i32
    return %arg0, %c0_i32 : i32, i32
  }
  func.func @transform_1(%arg0: i32) -> (i32, i32) {
    %c0_i32 = arith.constant 0 : i32
    %c0_i32_0 = arith.constant 0 : i32
    %c0_i32_1 = arith.constant 0 : i32
    return %c0_i32, %c0_i32_0 : i32, i32
  }
  func.func @transform_2(%arg0: i32) -> (i32, i32) {
    %c0_i32 = arith.constant 0 : i32
    %c0_i32_0 = arith.constant 0 : i32
    %c0_i32_1 = arith.constant 0 : i32
    return %c0_i32, %c0_i32_0 : i32, i32
  }
  func.func @transform_3(%arg0: i32) -> (i32, i32) {
    %c0_i32 = arith.constant 0 : i32
    %c0_i32_0 = arith.constant 0 : i32
    %c0_i32_1 = arith.constant 0 : i32
    return %c0_i32, %c0_i32_0 : i32, i32
  }
  func.func @transform_4(%arg0: i32) -> (i32, i32) {
    %c0_i32 = arith.constant 0 : i32
    %c0_i32_0 = arith.constant 0 : i32
    %c0_i32_1 = arith.constant 0 : i32
    return %c0_i32, %c0_i32_0 : i32, i32
  }
  func.func @transform_5(%arg0: i32) -> (i32, i32) {
    %c0_i32 = arith.constant 0 : i32
    %c0_i32_0 = arith.constant 0 : i32
    return %arg0, %c0_i32 : i32, i32
  }
}

</mosaic_0001>

<bundles_post_ra>
// kernel: neg.3
= control target key start
LH: loop header
LB: loop body
LE: loop exit
PB: predicated region body
PF: predicated region fallthrough
CT: control target
= control target key end

     0   :  { %s72_s0 = inlined_call_operand.vmem [shape: f32[32,32], index: 0, kind: input, shape index: {}]   ;;  %s73_s1 = inlined_call_operand.vmem [shape: f32[32,32], index: 1, kind: output, shape index: {}]  }
   0x1   :  { %v2_v0 = vld [vmem:[%s72_s0] sm:$0xff]  ;;  %v32_v1 = vld [vmem:[%s72_s0 + $0x8] sm:$0xff]  ;;  %v34_v2 = vld [vmem:[%s72_s0 + $0x10] sm:$0xff] }
   0x2   :  { %v5_v3 = vxor.u32 2147483648, %v2_v0  ;;  %v12_v4 = vxor.u32 2147483648, %v32_v1  ;;  %v20_v5 = vxor.u32 2147483648, %v34_v2  ;;  %v36_v6 = vld [vmem:[%s72_s0 + $0x18] sm:$0xff] }
   0x3   :  { %v28_v7 = vxor.u32 2147483648, %v36_v6 }
   0x4   :  { %7 = vst [vmem:[%s73_s1] sm:$0xff] %v5_v3 }
   0x5   :  { %33 = vst [vmem:[%s73_s1 + $0x8] sm:$0xff] %v12_v4 }
   0x6   :  { %35 = vst [vmem:[%s73_s1 + $0x10] sm:$0xff] %v20_v5 }
   0x7   :  { %37 = vst [vmem:[%s73_s1 + $0x18] sm:$0xff] %v28_v7 }

// kernel: squeeze.13
= control target key start
LH: loop header
LB: loop body
LE: loop exit
PB: predicated region body
PF: predicated region fallthrough
CT: control target
= control target key end

     0   :  { %s67_s10 = smov 28   ;;  %s68_s11 = smov 20   ;;  %vm3_vm0 = vcmask 31744   ;;  %vm9_vm1 = vcmask 261344   ;;  %vm15_vm2 = vcmask 228544   ;;  %vm21_vm3 = vcmask 195744   ;;  %s111_s0 = inlined_call_operand.vmem [shape: f32[1,8,4], index: 0, kind: input, shape index: {}]   ;;  %s112_s1 = inlined_call_operand.vmem [shape: f32[32], index: 1, kind: output, shape index: {}]  }
   0x1   :  { %v53_v0 = vld [vmem:[%s111_s0 + $0x7] sm:$0x1]   ;;  %v55_v1 = vld [vmem:[%s111_s0 + $0x5] sm:$0x1]   ;;  %v57_v2 = vld [vmem:[%s111_s0 + $0x3] sm:$0x1]  }
   0x2   :  { %7 = vrot.lane.b32.xlu0 %v53_v0, %s67_s10  ;;  %19 = vrot.lane.b32.xlu1 %v55_v1, %s68_s11  ;;  %s69_s14 = smov 12   ;;  %v54_v3 = vld [vmem:[%s111_s0 + $0x6] sm:$0x1]   ;;  %v56_v4 = vld [vmem:[%s111_s0 + $0x4] sm:$0x1]   ;;  %s70_s21 = smov 24  }
   0x3   :  { %31 = vrot.lane.b32.xlu2 %v57_v2, %s69_s14  ;;  %v58_v5 = vld [vmem:[%s111_s0 + $0x2] sm:$0x1]   ;;  %s71_s22 = smov 16   ;;  %s72_s23 = smov 8   ;;  %v59_v6 = vld [vmem:[%s111_s0 + $0x1] sm:$0x1]  }
   0x4   :  { %s73_s26 = smov 4   ;;  %v2_v7 = vld [vmem:[%s111_s0] sm:$0x1]   ;;  %vm27_vm4 = vcmask 162944   ;;  %vm33_vm5 = vcmask 130144   ;;  %vm39_vm6 = vcmask 97344  }
   0x5   :  { %4 = vst.msk [vmem:[#allocation0] sm:$0x1] %vm3_vm0, %v2_v7   ;;  %vm45_vm7 = vcmask 64544  }
   0xa   :  { %13 = vrot.lane.b32.xlu0 %v54_v3, %s70_s21  ;;  %25 = vrot.lane.b32.xlu1 %v56_v4, %s71_s22 }
   0xb   :  { %37 = vrot.lane.b32.xlu2 %v58_v5, %s72_s23 }
  0x12   :  { %43 = vrot.lane.b32.xlu0 %v59_v6, %s73_s26 }
  0x5d   :  { %v32_v8 = vpop.permute.xlu2 %31  }
  0x65   :  { %v38_v9 = vpop.permute.xlu2 %37  }
  0x74   :  { %v8_v10 = vpop.permute.xlu0 %7   ;;  %v20_v11 = vpop.permute.xlu1 %19  }
  0x75   :  { %10 = vst.msk [vmem:[#allocation0] sm:$0x1] %vm9_vm1, %v8_v10  }
  0x7c   :  { %v14_v12 = vpop.permute.xlu0 %13   ;;  %v26_v13 = vpop.permute.xlu1 %25  }
  0x7d   :  { %16 = vst.msk [vmem:[#allocation0] sm:$0x1] %vm15_vm2, %v14_v12  }
  0x7e   :  { %22 = vst.msk [vmem:[#allocation0] sm:$0x1] %vm21_vm3, %v20_v11  }
  0x7f   :  { %28 = vst.msk [vmem:[#allocation0] sm:$0x1] %vm27_vm4, %v26_v13  }
  0x80   :  { %34 = vst.msk [vmem:[#allocation0] sm:$0x1] %vm33_vm5, %v32_v8  }
  0x81   :  { %40 = vst.msk [vmem:[#allocation0] sm:$0x1] %vm39_vm6, %v38_v9  }
  0x84   :  { %v44_v14 = vpop.permute.xlu0 %43  }
  0x85   :  { %46 = vst.msk [vmem:[#allocation0] sm:$0x1] %vm45_vm7, %v44_v14  }
  0x8c   :  { %v49_v15 = vld [vmem:[#allocation0] sm:$0x1] }
  0x8d   :  { %52 = vst [vmem:[%s112_s1] sm:$0x1] %v49_v15 }

// kernel: tile.13
= control target key start
LH: loop header
LB: loop body
LE: loop exit
PB: predicated region body
PF: predicated region fallthrough
CT: control target
= control target key end

     0   :  { %s22_s0 = inlined_call_operand.vmem [shape: f32[64], index: 0, kind: input, shape index: {}]   ;;  %s23_s1 = inlined_call_operand.vmem [shape: f32[2,64], index: 1, kind: output, shape index: {}]  }
   0x1   :  { %v4_v0 = vld [vmem:[%s22_s0] ss:$0 sm:$0xff] }
   0x2   :  { %5 = vst [vmem:[%s23_s1] sm:$0x3] %v4_v0 }

// kernel: tile.18
= control target key start
LH: loop header
LB: loop body
LE: loop exit
PB: predicated region body
PF: predicated region fallthrough
CT: control target
= control target key end

     0   :  { %vm7_vm0 = vcmask 523264   ;;  %vm13_vm1 = vcmask 1048064   ;;  %s39_s0 = inlined_call_operand.vmem [shape: f32[2,64], index: 0, kind: input, shape index: {}]   ;;  %s40_s1 = inlined_call_operand.vmem [shape: f32[1,128], index: 1, kind: output, shape index: {}]  }
   0x1   :  { %v4_v0 = vld [vmem:[%s39_s0] sm:$0x3]  ;;  %s22_s0 = smov 64  }
   0x2   :  { %5 = vst [vmem:[#allocation1] sm:$0x3] %v4_v0 }
   0x9   :  { %v10_v1 = vld [vmem:[#allocation1 + $0x1] sm:$0x1]   ;;  %v6_v2 = vld [vmem:[#allocation1] sm:$0x1]  }
   0xa   :  { %11 = vrot.lane.b32.xlu0 %v10_v1, %s22_s0  ;;  %8 = vst.msk [vmem:[#allocation0] sm:$0x1] %vm7_vm0, %v6_v2  }
  0x7c   :  { %v12_v3 = vpop.permute.xlu0 %11  }
  0x7d   :  { %14 = vst.msk [vmem:[#allocation0] sm:$0x1] %vm13_vm1, %v12_v3  }
  0x84   :  { %v17_v4 = vld [vmem:[#allocation0] sm:$0x1] }
  0x85   :  { %20 = vst [vmem:[%s40_s1] sm:$0x1] %v17_v4 }

// kernel: afno2d_forward.1
= control target key start
LH: loop header
LB: loop body
LE: loop exit
PB: predicated region body
PF: predicated region fallthrough
CT: control target
= control target key end

     0   :  { %s840_s18 = smov 0   ;;  %s937_s0 = inlined_call_operand.vmem [shape: bf16[160,128], index: 0, kind: input, shape index: {}]   ;;  %s938_s1 = inlined_call_operand.vmem [shape: bf16[128,128], index: 1, kind: input, shape index: {}]   ;;  %s939_s2 = inlined_call_operand.vmem [shape: f32[1,128], index: 2, kind: input, shape index: {}]   ;;  %s940_s3 = inlined_call_operand.vmem [shape: bf16[128,128], index: 3, kind: input, shape index: {}]   ;;  %s941_s4 = inlined_call_operand.vmem [shape: f32[1,128], index: 4, kind: input, shape index: {}]   ;;  %s942_s5 = inlined_call_operand.vmem [shape: bf16[160,128], index: 5, kind: output, shape index: {}]  }
   0x1 LB: > { %s623_s19 = sadd.s32 4294967295, %s808_s18   ;;  %p627_p0 = scmp.ge.s32.totalorder %s808_s18, 1  ;;  %s808_s18 = sphi %s840_s18, %s15_s18  }
   0x2   : > { %p188_p1 = scmp.lt.s32.totalorder %s808_s18, 3 }
   0x4   : > { %p189_p2 = pnand %p627_p0, %p188_p1 }
   0x5   : > { %s216_s28 = smul.u32 (!%p189_p2), 10, %s623_s19 }
   0x6   : > { %192 = sbr.rel (%p189_p2) target bundleno = 370 (0x172), region = 40 }
   0x7   : > { %p217_p3 = scmp.lt.s32.totalorder (!%p189_p2), %s216_s28, 19 }
   0xb   : > { %v738_v0 = vld [vmem:[%s938_s1 + $0x38] sm:$0xff]  ;;  %v737_v1 = vld [vmem:[%s938_s1 + $0x30] sm:$0xff]  ;;  %v736_v2 = vld [vmem:[%s938_s1 + $0x28] sm:$0xff]  ;;  %s944_s28 = smov (!%p217_p3, %s216_s28), 19 }
   0xc   : > { %336 = vmatpush.bf16.msra.mxu0 %v738_v0  ;;  %776 = vmatpush.bf16.msra.mxu2 %v738_v0  ;;  %v735_v3 = vld [vmem:[%s938_s1 + $0x20] sm:$0xff]  ;;  %v734_v4 = vld [vmem:[%s938_s1 + $0x18] sm:$0xff]  ;;  %v733_v5 = vld [vmem:[%s938_s1 + $0x10] sm:$0xff]  ;;  %s628_s10 = sshll.u32 %s944_s28, 2 }
   0xd   : > { %v732_v6 = vld [vmem:[%s938_s1 + $0x8] sm:$0xff]  ;;  %v731_v7 = vld [vmem:[%s938_s1] sm:$0xff]  ;;  %s220_s15 = scalar_lea.vmem %s937_s0, %s628_s10  ;;  %v746_v10 = vld [vmem:[%s940_s3 + $0x38] sm:$0xff]  ;;  %s919_s16 = scalar_lea.vmem %s942_s5, %s628_s10 }
   0xe   : > { %v726_v8 = vld [vmem:[%s220_s15] sm:$0xff]  ;;  %v728_v9 = vld [vmem:[%s220_s15 + $0x10] sm:$0xff]  ;;  %453 = vmatpush.bf16.msra.mxu1 %v746_v10  ;;  %784 = vmatpush.bf16.msra.mxu3 %v746_v10  ;;  %v744_v12 = vld [vmem:[%s940_s3 + $0x28] sm:$0xff] }
   0xf   : > { %v745_v11 = vld [vmem:[%s940_s3 + $0x30] sm:$0xff]  ;;  %v743_v13 = vld [vmem:[%s940_s3 + $0x20] sm:$0xff]  ;;  %v727_v14 = vld [vmem:[%s220_s15 + $0x8] sm:$0xff] }
  0x10   : > { %337 = vmatpush.bf16.msra.mxu0 %v737_v1  ;;  %777 = vmatpush.bf16.msra.mxu2 %v737_v1  ;;  %v729_v15 = vld [vmem:[%s220_s15 + $0x18] sm:$0xff]  ;;  %v730_v16 = vld [vmem:[%s220_s15 + $0x20] sm:$0xff]  ;;  %v741_v18 = vld [vmem:[%s940_s3 + $0x10] sm:$0xff] }
  0x11   : > { %v742_v17 = vld [vmem:[%s940_s3 + $0x18] sm:$0xff]  ;;  %v740_v19 = vld [vmem:[%s940_s3 + $0x8] sm:$0xff]  ;;  %v739_v20 = vld [vmem:[%s940_s3] sm:$0xff] }
  0x12   : > { %454 = vmatpush.bf16.msra.mxu1 %v745_v11  ;;  %785 = vmatpush.bf16.msra.mxu3 %v745_v11  ;;  %v800_v22 = vld [vmem:[%s939_s2] ss:$0 sm:$0xff] }
  0x13   : > { %v910_v57 = vld [vmem:[%s941_s4] ss:$0 sm:$0xff] }
  0x14   : > { %338 = vmatpush.bf16.msra.mxu0 %v736_v2  ;;  %778 = vmatpush.bf16.msra.mxu2 %v736_v2 }
  0x16   : > { %455 = vmatpush.bf16.msra.mxu1 %v744_v12  ;;  %786 = vmatpush.bf16.msra.mxu3 %v744_v12 }
  0x18   : > { %339 = vmatpush.bf16.msra.mxu0 %v735_v3  ;;  %779 = vmatpush.bf16.msra.mxu2 %v735_v3 }
  0x1a   : > { %456 = vmatpush.bf16.msra.mxu1 %v743_v13  ;;  %787 = vmatpush.bf16.msra.mxu3 %v743_v13 }
  0x1c   : > { %340 = vmatpush.bf16.msra.mxu0 %v734_v4  ;;  %780 = vmatpush.bf16.msra.mxu2 %v734_v4 }
  0x1e   : > { %457 = vmatpush.bf16.msra.mxu1 %v742_v17  ;;  %788 = vmatpush.bf16.msra.mxu3 %v742_v17 }
  0x20   : > { %341 = vmatpush.bf16.msra.mxu0 %v733_v5  ;;  %781 = vmatpush.bf16.msra.mxu2 %v733_v5 }
  0x22   : > { %458 = vmatpush.bf16.msra.mxu1 %v741_v18  ;;  %789 = vmatpush.bf16.msra.mxu3 %v741_v18 }
  0x24   : > { %342 = vmatpush.bf16.msra.mxu0 %v732_v6  ;;  %782 = vmatpush.bf16.msra.mxu2 %v732_v6 }
  0x26   : > { %459 = vmatpush.bf16.msra.mxu1 %v740_v19  ;;  %790 = vmatpush.bf16.msra.mxu3 %v740_v19 }
  0x28   : > { %343 = vmatpush.bf16.msra.mxu0 %v731_v7  ;;  %783 = vmatpush.bf16.msra.mxu2 %v731_v7 }
  0x2a   : > { %460 = vmatpush.bf16.msra.mxu1 %v739_v20  ;;  %791 = vmatpush.bf16.msra.mxu3 %v739_v20 }
  0x2b   : > { %344 = vmatmul.bf16.vlgmr.msra.gmra.mxu0 %v726_v8  ;;  %354 = vmatmul.bf16.vlgmr.msra.gmra.mxu2 %v728_v9 }
  0x3b   : > { %349 = vmatmul.bf16.gmra.mxu0 %v727_v14  ;;  %359 = vmatmul.bf16.gmra.mxu2 %v729_v15 }
  0x4b   : > { %364 = vmatmul.bf16.gmra.mxu2 %v730_v16 }
  0xa8   : > { %v345_v21 = vpop.f32.mrf.mxu0 }
  0xa9   : > { %v346_v23 = vadd.f32 %v800_v22, %v345_v21 }
  0xab   : > { %v370_v26 = vmax.f32 %v346_v23, 0.0 }
  0xae   : > { %v355_v24 = vpop.f32.mrf.mxu2 }
  0xaf   : > { %v356_v47 = vadd.f32 %v800_v22, %v355_v24 }
  0xb0   : > { %v347_v25 = vpop.f32.mrf.mxu0 }
  0xb1   : > { %v348_v27 = vadd.f32 %v800_v22, %v347_v25  ;;  %v374_v49 = vmax.f32 %v356_v47, 0.0 }
  0xb3   : > { %v371_v28 = vmax.f32 %v348_v27, 0.0 }
  0xb5   : > { %v380_v29 = vpack.c.bf16 %v371_v28, %v370_v26 }
  0xb6   : > { %v357_v30 = vpop.f32.mrf.mxu2 }
  0xb7   : > { %461 = vmatmul.bf16.vlgmr.msra.gmra.mxu1 %v380_v29  ;;  %v358_v45 = vadd.f32 %v800_v22, %v357_v30 }
  0xb8   : > { %v350_v31 = vpop.f32.mrf.mxu0 }
  0xb9   : > { %v351_v32 = vadd.f32 %v800_v22, %v350_v31  ;;  %v375_v48 = vmax.f32 %v358_v45, 0.0 }
  0xbb   : > { %v372_v35 = vmax.f32 %v351_v32, 0.0  ;;  %v382_v51 = vpack.c.bf16 %v375_v48, %v374_v49 }
  0xbe   : > { %v360_v33 = vpop.f32.mrf.mxu2 }
  0xbf   : > { %v361_v38 = vadd.f32 %v800_v22, %v360_v33 }
  0xc0   : > { %v352_v34 = vpop.f32.mrf.mxu0 }
  0xc1   : > { %v353_v36 = vadd.f32 %v800_v22, %v352_v34  ;;  %v376_v42 = vmax.f32 %v361_v38, 0.0 }
  0xc3   : > { %v373_v37 = vmax.f32 %v353_v36, 0.0 }
  0xc5   : > { %v381_v39 = vpack.c.bf16 %v373_v37, %v372_v35 }
  0xc6   : > { %v362_v40 = vpop.f32.mrf.mxu2 }
  0xc7   : > { %v363_v41 = vadd.f32 %v800_v22, %v362_v40  ;;  %466 = vmatmul.bf16.gmra.mxu1 %v381_v39 }
  0xc9   : > { %v377_v43 = vmax.f32 %v363_v41, 0.0 }
  0xcb   : > { %v383_v44 = vpack.c.bf16 %v377_v43, %v376_v42 }
  0xcd   : > { %476 = vmatmul.bf16.vlgmr.msra.gmra.mxu3 %v383_v44 }
  0xce   : > { %v365_v46 = vpop.f32.mrf.mxu2 }
  0xcf   : > { %v366_v50 = vadd.f32 %v800_v22, %v365_v46 }
  0xd1   : > { %v378_v54 = vmax.f32 %v366_v50, 0.0 }
  0xd6   : > { %v367_v52 = vpop.f32.mrf.mxu2 }
  0xd7   : > { %v368_v53 = vadd.f32 %v800_v22, %v367_v52  ;;  %471 = vmatmul.bf16.gmra.mxu1 %v382_v51 }
  0xd9   : > { %v379_v55 = vmax.f32 %v368_v53, 0.0 }
  0xdb   : > { %v384_v56 = vpack.c.bf16 %v379_v55, %v378_v54 }
  0xdd   : > { %481 = vmatmul.bf16.gmra.mxu3 %v384_v56 }
 0x134   : > { %v462_v58 = vpop.f32.mrf.mxu1 }
 0x135   : > { %v463_v59 = vadd.f32 %v910_v57, %v462_v58 }
 0x137   : > { %v517_v60 = vadd.f32 0.01, %v463_v59  ;;  %vm507_vm0 = vcmp.lt.f32.partialorder %v463_v59, -0.01  ;;  %v714_v63 = vadd.f32 -0.01, %v463_v59 }
 0x138   : > { %vm487_vm2 = vcmp.gt.f32.partialorder %v463_v59, 0.01 }
 0x139   : > { %v527_v1 = vsel %vm507_vm0, %v517_v60, 0.0 }
 0x13a   : > { %v537_v4 = vsel %vm487_vm2, %v714_v63, %v527_v1 }
 0x13c   : > { %v464_v61 = vpop.f32.mrf.mxu1 }
 0x13d   : > { %v465_v62 = vadd.f32 %v910_v57, %v464_v61 }
 0x13f   : > { %v715_v0 = vadd.f32 -0.01, %v465_v62  ;;  %vm508_vm1 = vcmp.lt.f32.partialorder %v465_v62, -0.01  ;;  %v518_v2 = vadd.f32 0.01, %v465_v62 }
 0x140   : > { %vm488_vm3 = vcmp.gt.f32.partialorder %v465_v62, 0.01 }
 0x141   : > { %v528_v3 = vsel %vm508_vm1, %v518_v2, 0.0 }
 0x142   : > { %v538_v5 = vsel %vm488_vm3, %v715_v0, %v528_v3 }
 0x143   : > { %v750_v6 = vpack.c.bf16 %v538_v5, %v537_v4 }
 0x144   : > { %v467_v7 = vpop.f32.mrf.mxu1 }
 0x145   : > { %751 = vst [vmem:[%s919_s16] sm:$0xff] %v750_v6   ;;  %v468_v8 = vadd.f32 %v910_v57, %v467_v7 }
 0x147   : > { %v519_v9 = vadd.f32 0.01, %v468_v8  ;;  %vm509_vm4 = vcmp.lt.f32.partialorder %v468_v8, -0.01  ;;  %v716_v12 = vadd.f32 -0.01, %v468_v8 }
 0x148   : > { %vm489_vm6 = vcmp.gt.f32.partialorder %v468_v8, 0.01 }
 0x149   : > { %v529_v14 = vsel %vm509_vm4, %v519_v9, 0.0 }
 0x14a   : > { %v539_v18 = vsel %vm489_vm6, %v716_v12, %v529_v14 }
 0x14c   : > { %v469_v10 = vpop.f32.mrf.mxu1 }
 0x14d   : > { %v470_v11 = vadd.f32 %v910_v57, %v469_v10 }
 0x14f   : > { %v717_v13 = vadd.f32 -0.01, %v470_v11  ;;  %vm510_vm5 = vcmp.lt.f32.partialorder %v470_v11, -0.01  ;;  %v520_v15 = vadd.f32 0.01, %v470_v11 }
 0x150   : > { %v477_v16 = vpop.f32.mrf.mxu3  ;;  %vm490_vm7 = vcmp.gt.f32.partialorder %v470_v11, 0.01 }
 0x151   : > { %v530_v17 = vsel %vm510_vm5, %v520_v15, 0.0  ;;  %v478_v20 = vadd.f32 %v910_v57, %v477_v16 }
 0x152   : > { %v540_v19 = vsel %vm490_vm7, %v717_v13, %v530_v17 }
 0x153   : > { %v755_v21 = vpack.c.bf16 %v540_v19, %v539_v18  ;;  %v523_v23 = vadd.f32 0.01, %v478_v20  ;;  %vm513_vm8 = vcmp.lt.f32.partialorder %v478_v20, -0.01  ;;  %v720_v27 = vadd.f32 -0.01, %v478_v20 }
 0x154   : > { %v472_v22 = vpop.f32.mrf.mxu1  ;;  %vm493_vm10 = vcmp.gt.f32.partialorder %v478_v20, 0.01 }
 0x155   : > { %772 = vst [vmem:[%s919_s16 + $0x8] sm:$0xff] %v755_v21   ;;  %v473_v24 = vadd.f32 %v910_v57, %v472_v22  ;;  %v533_v28 = vsel %vm513_vm8, %v523_v23, 0.0 }
 0x156   : > { %v543_v34 = vsel %vm493_vm10, %v720_v27, %v533_v28 }
 0x157   : > { %v521_v30 = vadd.f32 0.01, %v473_v24  ;;  %vm511_vm11 = vcmp.lt.f32.partialorder %v473_v24, -0.01  ;;  %v718_v36 = vadd.f32 -0.01, %v473_v24 }
 0x158   : > { %v479_v25 = vpop.f32.mrf.mxu3  ;;  %vm491_vm14 = vcmp.gt.f32.partialorder %v473_v24, 0.01 }
 0x159   : > { %v480_v26 = vadd.f32 %v910_v57, %v479_v25  ;;  %v531_v39 = vsel %vm511_vm11, %v521_v30, 0.0 }
 0x15a   : > { %v541_v44 = vsel %vm491_vm14, %v718_v36, %v531_v39 }
 0x15b   : > { %v721_v29 = vadd.f32 -0.01, %v480_v26  ;;  %vm514_vm9 = vcmp.lt.f32.partialorder %v480_v26, -0.01  ;;  %v524_v31 = vadd.f32 0.01, %v480_v26 }
 0x15c   : > { %v474_v32 = vpop.f32.mrf.mxu1  ;;  %vm494_vm12 = vcmp.gt.f32.partialorder %v480_v26, 0.01 }
 0x15d   : > { %v475_v33 = vadd.f32 %v910_v57, %v474_v32  ;;  %v534_v35 = vsel %vm514_vm9, %v524_v31, 0.0 }
 0x15e   : > { %v544_v37 = vsel %vm494_vm12, %v721_v29, %v534_v35 }
 0x15f   : > { %v719_v38 = vadd.f32 -0.01, %v475_v33  ;;  %vm512_vm13 = vcmp.lt.f32.partialorder %v475_v33, -0.01  ;;  %v765_v40 = vpack.c.bf16 %v544_v37, %v543_v34  ;;  %v522_v41 = vadd.f32 0.01, %v475_v33 }
 0x160   : > { %v482_v42 = vpop.f32.mrf.mxu3  ;;  %vm492_vm15 = vcmp.gt.f32.partialorder %v475_v33, 0.01 }
 0x161   : > { %774 = vst [vmem:[%s919_s16 + $0x18] sm:$0xff] %v765_v40   ;;  %v532_v43 = vsel %vm512_vm13, %v522_v41, 0.0  ;;  %v483_v47 = vadd.f32 %v910_v57, %v482_v42 }
 0x162   : > { %v542_v45 = vsel %vm492_vm15, %v719_v38, %v532_v43 }
 0x163   : > { %v760_v46 = vpack.c.bf16 %v542_v45, %v541_v44  ;;  %v525_v48 = vadd.f32 0.01, %v483_v47  ;;  %vm515_vm0 = vcmp.lt.f32.partialorder %v483_v47, -0.01  ;;  %v722_v51 = vadd.f32 -0.01, %v483_v47 }
 0x164   : > { %vm495_vm2 = vcmp.gt.f32.partialorder %v483_v47, 0.01 }
 0x165   : > { %773 = vst [vmem:[%s919_s16 + $0x10] sm:$0xff] %v760_v46   ;;  %v535_v53 = vsel %vm515_vm0, %v525_v48, 0.0 }
 0x166   : > { %v545_v56 = vsel %vm495_vm2, %v722_v51, %v535_v53 }
 0x168   : > { %v484_v49 = vpop.f32.mrf.mxu3 }
 0x169   : > { %v485_v50 = vadd.f32 %v910_v57, %v484_v49 }
 0x16b   : > { %v723_v52 = vadd.f32 -0.01, %v485_v50  ;;  %vm516_vm1 = vcmp.lt.f32.partialorder %v485_v50, -0.01  ;;  %v526_v54 = vadd.f32 0.01, %v485_v50 }
 0x16c   : > { %vm496_vm3 = vcmp.gt.f32.partialorder %v485_v50, 0.01 }
 0x16d   : > { %v536_v55 = vsel %vm516_vm1, %v526_v54, 0.0 }
 0x16e   : > { %v546_v58 = vsel %vm496_vm3, %v723_v52, %v536_v55 }
 0x16f   : > { %v770_v59 = vpack.c.bf16 %v546_v58, %v545_v56 }
 0x171   : > { %775 = vst [vmem:[%s919_s16 + $0x20] sm:$0xff] %v770_v59  }
 0x172 PF: > { %s15_s18 = sadd.s32 1, %s808_s18  }
 0x173   : > { %p12_p4 = scmp.ge.s32.totalorder %s15_s18, 4  }
 0x175   :  { %14 = sbr.rel (!%p12_p4) target bundleno = 1 (0x1), region = 70 }

// kernel: reverse.1
= control target key start
LH: loop header
LB: loop body
LE: loop exit
PB: predicated region body
PF: predicated region fallthrough
CT: control target
= control target key end

     0   :  { %s344_s0 = inlined_call_operand.vmem [shape: f32[2,32,16,7], index: 0, kind: input, shape index: {}]   ;;  %s345_s1 = inlined_call_operand.vmem [shape: f32[2,32,16,7], index: 1, kind: output, shape index: {}]  }
   0x1   :  { %v112_v0 = vld [vmem:[%s344_s0 + $0x60] sm:$0xff]  ;;  %v113_v1 = vld [vmem:[%s344_s0 + $0xd0] sm:$0xff]  ;;  %v138_v14 = vld [vmem:[%s344_s0 + $0x68] sm:$0xff] }
   0x2   :  { %v115_v2 = vld [vmem:[%s344_s0 + $0x50] sm:$0xff]  ;;  %4 = vst [vmem:[%s345_s1] sm:$0xff] %v112_v0  ;;  %v117_v3 = vld [vmem:[%s344_s0 + $0xc0] sm:$0xff]  ;;  %v140_v15 = vld [vmem:[%s344_s0 + $0xd8] sm:$0xff] }
   0x3   :  { %114 = vst [vmem:[%s345_s1 + $0x70] sm:$0xff] %v113_v1  ;;  %v119_v4 = vld [vmem:[%s344_s0 + $0x40] sm:$0xff]  ;;  %v121_v5 = vld [vmem:[%s344_s0 + $0xb0] sm:$0xff]  ;;  %v142_v16 = vld [vmem:[%s344_s0 + $0x58] sm:$0xff] }
   0x4   :  { %116 = vst [vmem:[%s345_s1 + $0x10] sm:$0xff] %v115_v2  ;;  %v123_v6 = vld [vmem:[%s344_s0 + $0x30] sm:$0xff]  ;;  %v125_v7 = vld [vmem:[%s344_s0 + $0xa0] sm:$0xff]  ;;  %v144_v17 = vld [vmem:[%s344_s0 + $0xc8] sm:$0xff] }
   0x5   :  { %118 = vst [vmem:[%s345_s1 + $0x80] sm:$0xff] %v117_v3  ;;  %v127_v8 = vld [vmem:[%s344_s0 + $0x20] sm:$0xff]  ;;  %v129_v9 = vld [vmem:[%s344_s0 + $0x90] sm:$0xff]  ;;  %v146_v18 = vld [vmem:[%s344_s0 + $0x48] sm:$0xff] }
   0x6   :  { %120 = vst [vmem:[%s345_s1 + $0x20] sm:$0xff] %v119_v4  ;;  %v131_v10 = vld [vmem:[%s344_s0 + $0x10] sm:$0xff]  ;;  %v133_v11 = vld [vmem:[%s344_s0 + $0x80] sm:$0xff]  ;;  %v148_v19 = vld [vmem:[%s344_s0 + $0xb8] sm:$0xff] }
   0x7   :  { %122 = vst [vmem:[%s345_s1 + $0x90] sm:$0xff] %v121_v5  ;;  %v49_v12 = vld [vmem:[%s344_s0] sm:$0xff]  ;;  %v136_v13 = vld [vmem:[%s344_s0 + $0x70] sm:$0xff]  ;;  %v150_v20 = vld [vmem:[%s344_s0 + $0x38] sm:$0xff] }
   0x8   :  { %124 = vst [vmem:[%s345_s1 + $0x30] sm:$0xff] %v123_v6  ;;  %v152_v21 = vld [vmem:[%s344_s0 + $0xa8] sm:$0xff]  ;;  %v156_v23 = vld [vmem:[%s344_s0 + $0x98] sm:$0xff] }
   0x9   :  { %126 = vst [vmem:[%s345_s1 + $0xa0] sm:$0xff] %v125_v7  ;;  %v154_v22 = vld [vmem:[%s344_s0 + $0x28] sm:$0xff]  ;;  %v158_v24 = vld [vmem:[%s344_s0 + $0x18] sm:$0xff] }
   0xa   :  { %128 = vst [vmem:[%s345_s1 + $0x40] sm:$0xff] %v127_v8  ;;  %v160_v25 = vld [vmem:[%s344_s0 + $0x88] sm:$0xff]  ;;  %v164_v27 = vld [vmem:[%s344_s0 + $0x78] sm:$0xff] }
   0xb   :  { %130 = vst [vmem:[%s345_s1 + $0xb0] sm:$0xff] %v129_v9  ;;  %v162_v26 = vld [vmem:[%s344_s0 + $0x8] sm:$0xff] }
   0xc   :  { %132 = vst [vmem:[%s345_s1 + $0x50] sm:$0xff] %v131_v10 }
   0xd   :  { %134 = vst [vmem:[%s345_s1 + $0xc0] sm:$0xff] %v133_v11 }
   0xe   :  { %135 = vst [vmem:[%s345_s1 + $0x60] sm:$0xff] %v49_v12 }
   0xf   :  { %137 = vst [vmem:[%s345_s1 + $0xd0] sm:$0xff] %v136_v13 }
  0x10   :  { %139 = vst [vmem:[%s345_s1 + $0x8] sm:$0xff] %v138_v14 }
  0x11   :  { %141 = vst [vmem:[%s345_s1 + $0x78] sm:$0xff] %v140_v15 }
  0x12   :  { %143 = vst [vmem:[%s345_s1 + $0x18] sm:$0xff] %v142_v16 }
  0x13   :  { %145 = vst [vmem:[%s345_s1 + $0x88] sm:$0xff] %v144_v17 }
  0x14   :  { %147 = vst [vmem:[%s345_s1 + $0x28] sm:$0xff] %v146_v18 }
  0x15   :  { %149 = vst [vmem:[%s345_s1 + $0x98] sm:$0xff] %v148_v19 }
  0x16   :  { %151 = vst [vmem:[%s345_s1 + $0x38] sm:$0xff] %v150_v20 }
  0x17   :  { %153 = vst [vmem:[%s345_s1 + $0xa8] sm:$0xff] %v152_v21 }
  0x18   :  { %155 = vst [vmem:[%s345_s1 + $0x48] sm:$0xff] %v154_v22 }
  0x19   :  { %157 = vst [vmem:[%s345_s1 + $0xb8] sm:$0xff] %v156_v23 }
  0x1a   :  { %159 = vst [vmem:[%s345_s1 + $0x58] sm:$0xff] %v158_v24 }
  0x1b   :  { %161 = vst [vmem:[%s345_s1 + $0xc8] sm:$0xff] %v160_v25 }
  0x1c   :  { %163 = vst [vmem:[%s345_s1 + $0x68] sm:$0xff] %v162_v26 }
  0x1d   :  { %165 = vst [vmem:[%s345_s1 + $0xd8] sm:$0xff] %v164_v27 }

</bundles_post_ra>
